<compile_context>
chip_gen: v7x
topology: tpu7x:2x2x1
jax: 0.10.0
libtpu: 0.0.40
codegen_flags: <defaults>
</compile_context>

<pallas_src>
import jax
import jax.numpy as jnp
from jax.experimental import pallas as pl
from jax.experimental.pallas import tpu as pltpu

LANE = 128
SUBLANE = 8


def _round_up(n, m):
    return ((n + m - 1) // m) * m


# ----------------------------------------------------------------------------
# Fused kernel factory (layer count / true feature widths baked in at trace time)
# ----------------------------------------------------------------------------
def _make_fused_kernel(n_layers, out_dims, out_dims_pad):
    """out_dims[i] = unpadded output width of layer i; out_dims_pad[i] = padded."""

    def kernel(x_ref, *refs):
        o_ref = refs[-1]
        p = refs[:-1]  # (w0, b0, g0, be0, w1, b1, g1, be1, ...)

        h = x_ref[...].astype(jnp.float32)
        for li in range(n_layers):
            w = p[4 * li][...]          # bf16 (in_pad, out_pad), pre-transposed
            b = p[4 * li + 1][...]      # f32  (1, out_pad)
            gamma = p[4 * li + 2][...]  # f32  (1, out_pad)
            beta = p[4 * li + 3][...]   # f32  (1, out_pad)
            d = out_dims[li]
            inv_d = 1.0 / float(d)

            # bf16 operands -> full-rate MXU; f32 accumulation.
            y = jnp.dot(h.astype(w.dtype), w,
                        preferred_element_type=jnp.float32) + b

            # LayerNorm over the valid feature columns (eps = 1e-5, biased var).
            mean = jnp.sum(y, axis=-1, keepdims=True) * inv_d
            if d == out_dims_pad[li]:
                # No padding: classic centered-sum variance (most robust).
                centered = y - mean
                var = jnp.sum(centered * centered, axis=-1, keepdims=True) * inv_d
                y_hat = centered * jax.lax.rsqrt(var + 1e-5) * gamma + beta
            else:
                # Padded columns of y are exactly zero (zero W cols / bias), so
                # sum(y) and sum(y*y) over the padded tile equal the sums over
                # the valid columns -> mask-free exact mean/variance.
                var = jnp.sum(y * y, axis=-1, keepdims=True) * inv_d - mean * mean
                var = jnp.maximum(var, 0.0)
                # gamma/beta are zero on padded columns -> padded y_hat cols = 0.
                y_hat = (y - mean) * jax.lax.rsqrt(var + 1e-5) * gamma + beta
            h = jnp.tanh(y_hat)  # tanh(0) == 0 keeps padded columns clean

        # Final F.normalize(x, p=2, dim=1): rsqrt (EUP) + multiply,
        # rsqrt(max(ss, 1e-24)) == 1 / max(||x||, 1e-12).
        sumsq = jnp.sum(h * h, axis=-1, keepdims=True)
        inv_norm = jax.lax.rsqrt(jnp.maximum(sumsq, 1e-24))
        o_ref[...] = (h * inv_norm).astype(o_ref.dtype)

    return kernel


# ----------------------------------------------------------------------------
# One-time parameter preparation: pad to lane multiples, cast weights to bf16.
# ----------------------------------------------------------------------------
def prepare_params(params, input_dim, *, weight_dtype=jnp.bfloat16):
    n_layers = len(params)
    out_dims = [w.shape[1] for (w, _, _, _) in params]
    dims = [input_dim] + out_dims
    dims_pad = [_round_up(d, LANE) for d in dims]

    padded = []
    for li, (w, b, gamma, beta) in enumerate(params):
        din, dout = dims[li], dims[li + 1]
        dinp, doutp = dims_pad[li], dims_pad[li + 1]
        w_p = jnp.zeros((dinp, doutp), weight_dtype).at[:din, :dout].set(
            w.astype(weight_dtype))
        b_p = jnp.zeros((1, doutp), jnp.float32).at[:, :dout].set(b.reshape(1, -1))
        g_p = jnp.zeros((1, doutp), jnp.float32).at[:, :dout].set(gamma.reshape(1, -1))
        be_p = jnp.zeros((1, doutp), jnp.float32).at[:, :dout].set(beta.reshape(1, -1))
        padded += [w_p, b_p, g_p, be_p]

    return {
        "n_layers": n_layers,
        "out_dims": out_dims,
        "dims": dims,
        "dims_pad": dims_pad,
        "padded_params": padded,
    }


# ----------------------------------------------------------------------------
# Forward: pad x, run one fused pallas_call over batch tiles.
# ----------------------------------------------------------------------------
def feature_extractor_forward(x, prepared, *, batch_tile=None):
    batch, in_dim = x.shape
    n_layers = prepared["n_layers"]
    out_dims = prepared["out_dims"]
    dims = prepared["dims"]
    dims_pad = prepared["dims_pad"]
    padded_params = prepared["padded_params"]
    assert in_dim == dims[0]

    # Batch tiling: up to 256 rows per step (sublane-rounded); if the batch is
    # big enough, force >= 2 grid steps so v7x can shard across both TCs.
    bp = _round_up(batch, SUBLANE)
    if batch_tile is None:
        batch_tile = min(256, bp)
        if bp >= 2 * SUBLANE and bp // batch_tile < 2:
            batch_tile = max(SUBLANE, _round_up((bp + 1) // 2, SUBLANE))
    batch_pad = _round_up(batch, batch_tile)

    # Only the activation is padded per call (params were prepared once).
    x_p = jnp.zeros((batch_pad, dims_pad[0]), jnp.float32).at[:batch, :in_dim].set(x)

    kernel = _make_fused_kernel(n_layers, out_dims, dims_pad[1:])

    # Activation/output: blocked over batch. Params: whole-array VMEM residents
    # (grid-invariant -> not pipelined, single buffer).
    resident = pl.BlockSpec(memory_space=pltpu.MemorySpace.VMEM)
    in_specs = [pl.BlockSpec((batch_tile, dims_pad[0]), lambda i: (i, 0))]
    in_specs += [resident] * (4 * n_layers)
    out_spec = pl.BlockSpec((batch_tile, dims_pad[-1]), lambda i: (i, 0))

    # VMEM budget: resident params + double-buffered x/out tiles + f32 temps.
    param_bytes = sum(int(a.size) * a.dtype.itemsize for a in padded_params)
    max_dim = max(dims_pad)
    tile_bytes = batch_tile * max_dim * 4
    vmem_bytes = param_bytes + 8 * tile_bytes + (4 << 20)
    vmem_bytes = int(min(max(vmem_bytes, 32 << 20), 100 << 20))

    out_padded = pl.pallas_call(
        kernel,
        out_shape=jax.ShapeDtypeStruct((batch_pad, dims_pad[-1]), jnp.float32),
        grid=(batch_pad // batch_tile,),
        in_specs=in_specs,
        out_specs=out_spec,
        compiler_params=pltpu.CompilerParams(
            dimension_semantics=("parallel",),
            vmem_limit_bytes=vmem_bytes,
        ),
    )(x_p, *padded_params)

    return out_padded[:batch, : dims[-1]]


# ----------------------------------------------------------------------------
# Parameter construction (deterministic, mimics nn.Linear / nn.LayerNorm init)
# ----------------------------------------------------------------------------
def init_params(key, input_dim, hidden_layers):
    dims = [input_dim] + list(hidden_layers)
    params = []
    for i in range(len(dims) - 1):
        fan_in, fan_out = dims[i], dims[i + 1]
        key, kw, kb = jax.random.split(key, 3)
        bound = 1.0 / jnp.sqrt(fan_in)
        # Stored already transposed: (in_features, out_features).
        w = jax.random.uniform(kw, (fan_in, fan_out), jnp.float32, -bound, bound)
        b = jax.random.uniform(kb, (1, fan_out), jnp.float32, -bound, bound)
        gamma = jnp.ones((1, fan_out), jnp.float32)  # LayerNorm weight
        beta = jnp.zeros((1, fan_out), jnp.float32)  # LayerNorm bias
        params.append((w, b, gamma, beta))
    return params


# ----------------------------------------------------------------------------
# Pure-JAX references for sanity checks
# ----------------------------------------------------------------------------
def reference_forward(x, params, matmul_dtype=None):
    """matmul_dtype=jnp.bfloat16 mimics the kernel's MXU precision exactly."""
    h = x.astype(jnp.float32)
    for (w, b, gamma, beta) in params:
        if matmul_dtype is not None:
            y = jnp.dot(h.astype(matmul_dtype), w.astype(matmul_dtype),
                        preferred_element_type=jnp.float32) + b
        else:
            y = h @ w + b
        mean = jnp.mean(y, axis=-1, keepdims=True)
        var = jnp.mean((y - mean) ** 2, axis=-1, keepdims=True)
        y = (y - mean) / jnp.sqrt(var + 1e-5)
        y = y * gamma + beta
        h = jnp.tanh(y)
    norm = jnp.maximum(jnp.sqrt(jnp.sum(h * h, axis=1, keepdims=True)), 1e-12)
    return h / norm


if __name__ == "__main__":
    key = jax.random.PRNGKey(0)
    batch = 2
    input_dim = 16
    hidden_layers = [32, 32]

    k_x, k_p = jax.random.split(key)
    x = jax.random.normal(k_x, (batch, input_dim), jnp.float32)
    params = init_params(k_p, input_dim, hidden_layers)

    prepared = prepare_params(params, input_dim)  # pad + bf16-cast once
    out = feature_extractor_forward(x, prepared)
    out = jax.block_until_ready(out)

    assert out.shape == (batch, hidden_layers[-1])
    assert bool(jnp.all(jnp.isfinite(out)))

    # Check against a reference that uses the same bf16-operand / f32-accum matmul.
    ref_bf16 = reference_forward(x, params, matmul_dtype=jnp.bfloat16)
    assert jnp.allclose(out, ref_bf16, atol=2e-3, rtol=2e-3), "mismatch vs bf16-matmul reference"

    # Loose sanity check against the full-f32 PyTorch-semantics reference.
    ref_f32 = reference_forward(x, params)
    assert jnp.allclose(out, ref_f32, atol=5e-2, rtol=5e-2), "mismatch vs f32 reference"

    print("KERNEL_OK")
</pallas_src>

<mosaic_0001>
module attributes {stable_mosaic.version = 11 : i64} {
  func.func @kernel(%arg0: i32, %arg1: memref<8x128xf32, #tpu.memory_space<vmem>>, %arg2: memref<128x128xbf16, #tpu.memory_space<vmem>>, %arg3: memref<1x128xf32, #tpu.memory_space<vmem>>, %arg4: memref<1x128xf32, #tpu.memory_space<vmem>>, %arg5: memref<1x128xf32, #tpu.memory_space<vmem>>, %arg6: memref<128x128xbf16, #tpu.memory_space<vmem>>, %arg7: memref<1x128xf32, #tpu.memory_space<vmem>>, %arg8: memref<1x128xf32, #tpu.memory_space<vmem>>, %arg9: memref<1x128xf32, #tpu.memory_space<vmem>>, %arg10: memref<8x128xf32, #tpu.memory_space<vmem>>) attributes {dimension_semantics = [#tpu.dimension_semantics<parallel>], iteration_bounds = array<i64: 1>, scalar_prefetch = 0 : i64, scratch_operands = 0 : i64, tpu.core_type = #tpu.core_type<tc>, window_params = [{transform_indices = @transform_0, window_bounds = array<i64: 8, 128>}, {pipeline_mode = #tpu.pipeline_mode<synchronous>, transform_indices = @transform_1, window_bounds = array<i64: 128, 128>}, {pipeline_mode = #tpu.pipeline_mode<synchronous>, transform_indices = @transform_2, window_bounds = array<i64: 1, 128>}, {pipeline_mode = #tpu.pipeline_mode<synchronous>, transform_indices = @transform_3, window_bounds = array<i64: 1, 128>}, {pipeline_mode = #tpu.pipeline_mode<synchronous>, transform_indices = @transform_4, window_bounds = array<i64: 1, 128>}, {pipeline_mode = #tpu.pipeline_mode<synchronous>, transform_indices = @transform_5, window_bounds = array<i64: 128, 128>}, {pipeline_mode = #tpu.pipeline_mode<synchronous>, transform_indices = @transform_6, window_bounds = array<i64: 1, 128>}, {pipeline_mode = #tpu.pipeline_mode<synchronous>, transform_indices = @transform_7, window_bounds = array<i64: 1, 128>}, {pipeline_mode = #tpu.pipeline_mode<synchronous>, transform_indices = @transform_8, window_bounds = array<i64: 1, 128>}, {transform_indices = @transform_9, window_bounds = array<i64: 8, 128>}]} {
    %c0 = arith.constant 0 : index
    %c0_0 = arith.constant 0 : index
    %0 = vector.load %arg1[%c0, %c0_0] : memref<8x128xf32, #tpu.memory_space<vmem>>, vector<8x128xf32>
    %c0_1 = arith.constant 0 : index
    %c0_2 = arith.constant 0 : index
    %1 = vector.load %arg2[%c0_1, %c0_2] : memref<128x128xbf16, #tpu.memory_space<vmem>>, vector<128x128xbf16>
    %c0_3 = arith.constant 0 : index
    %c0_4 = arith.constant 0 : index
    %2 = vector.load %arg3[%c0_3, %c0_4] : memref<1x128xf32, #tpu.memory_space<vmem>>, vector<1x128xf32>
    %c0_5 = arith.constant 0 : index
    %c0_6 = arith.constant 0 : index
    %3 = vector.load %arg4[%c0_5, %c0_6] : memref<1x128xf32, #tpu.memory_space<vmem>>, vector<1x128xf32>
    %c0_7 = arith.constant 0 : index
    %c0_8 = arith.constant 0 : index
    %4 = vector.load %arg5[%c0_7, %c0_8] : memref<1x128xf32, #tpu.memory_space<vmem>>, vector<1x128xf32>
    %5 = arith.truncf %0 : vector<8x128xf32> to vector<8x128xbf16>
    %cst = arith.constant dense<0.000000e+00> : vector<8x128xf32>
    %6 = tpu.matmul %5, %1, %cst {dimension_numbers = #tpu.dot_dimension_numbers<[1], [0], [0], [1], [0, 0, 1, 1], [], []>} : vector<8x128xbf16>, vector<128x128xbf16>, vector<8x128xf32> -> vector<8x128xf32>
    %7 = vector.broadcast %2 : vector<1x128xf32> to vector<8x128xf32>
    %8 = arith.addf %6, %7 : vector<8x128xf32>
    %cst_9 = arith.constant dense<0.000000e+00> : vector<8xf32>
    %9 = vector.multi_reduction <add>, %8, %cst_9 [1] : vector<8x128xf32> to vector<8xf32>
    %10 = vector.shape_cast %9 : vector<8xf32> to vector<8x1xf32>
    %cst_10 = arith.constant 3.125000e-02 : f32
    %11 = vector.broadcast %cst_10 : f32 to vector<8x1xf32>
    %12 = arith.mulf %10, %11 : vector<8x1xf32>
    %13 = arith.mulf %8, %8 : vector<8x128xf32>
    %cst_11 = arith.constant dense<0.000000e+00> : vector<8xf32>
    %14 = vector.multi_reduction <add>, %13, %cst_11 [1] : vector<8x128xf32> to vector<8xf32>
    %15 = vector.shape_cast %14 : vector<8xf32> to vector<8x1xf32>
    %cst_12 = arith.constant 3.125000e-02 : f32
    %16 = vector.broadcast %cst_12 : f32 to vector<8x1xf32>
    %17 = arith.mulf %15, %16 : vector<8x1xf32>
    %18 = arith.mulf %12, %12 : vector<8x1xf32>
    %19 = arith.subf %17, %18 : vector<8x1xf32>
    %cst_13 = arith.constant 0.000000e+00 : f32
    %20 = vector.broadcast %cst_13 : f32 to vector<8x1xf32>
    %21 = arith.maximumf %19, %20 : vector<8x1xf32>
    %22 = vector.broadcast %12 : vector<8x1xf32> to vector<8x128xf32>
    %23 = arith.subf %8, %22 : vector<8x128xf32>
    %cst_14 = arith.constant 9.99999974E-6 : f32
    %24 = vector.broadcast %cst_14 : f32 to vector<8x1xf32>
    %25 = arith.addf %21, %24 : vector<8x1xf32>
    %26 = math.rsqrt %25 : vector<8x1xf32>
    %27 = vector.broadcast %26 : vector<8x1xf32> to vector<8x128xf32>
    %28 = arith.mulf %23, %27 : vector<8x128xf32>
    %29 = vector.broadcast %3 : vector<1x128xf32> to vector<8x128xf32>
    %30 = arith.mulf %28, %29 : vector<8x128xf32>
    %31 = vector.broadcast %4 : vector<1x128xf32> to vector<8x128xf32>
    %32 = arith.addf %30, %31 : vector<8x128xf32>
    %33 = math.tanh %32 : vector<8x128xf32>
    %c0_15 = arith.constant 0 : index
    %c0_16 = arith.constant 0 : index
    %34 = vector.load %arg6[%c0_15, %c0_16] : memref<128x128xbf16, #tpu.memory_space<vmem>>, vector<128x128xbf16>
    %c0_17 = arith.constant 0 : index
    %c0_18 = arith.constant 0 : index
    %35 = vector.load %arg7[%c0_17, %c0_18] : memref<1x128xf32, #tpu.memory_space<vmem>>, vector<1x128xf32>
    %c0_19 = arith.constant 0 : index
    %c0_20 = arith.constant 0 : index
    %36 = vector.load %arg8[%c0_19, %c0_20] : memref<1x128xf32, #tpu.memory_space<vmem>>, vector<1x128xf32>
    %c0_21 = arith.constant 0 : index
    %c0_22 = arith.constant 0 : index
    %37 = vector.load %arg9[%c0_21, %c0_22] : memref<1x128xf32, #tpu.memory_space<vmem>>, vector<1x128xf32>
    %38 = arith.truncf %33 : vector<8x128xf32> to vector<8x128xbf16>
    %cst_23 = arith.constant dense<0.000000e+00> : vector<8x128xf32>
    %39 = tpu.matmul %38, %34, %cst_23 {dimension_numbers = #tpu.dot_dimension_numbers<[1], [0], [0], [1], [0, 0, 1, 1], [], []>} : vector<8x128xbf16>, vector<128x128xbf16>, vector<8x128xf32> -> vector<8x128xf32>
    %40 = vector.broadcast %35 : vector<1x128xf32> to vector<8x128xf32>
    %41 = arith.addf %39, %40 : vector<8x128xf32>
    %cst_24 = arith.constant dense<0.000000e+00> : vector<8xf32>
    %42 = vector.multi_reduction <add>, %41, %cst_24 [1] : vector<8x128xf32> to vector<8xf32>
    %43 = vector.shape_cast %42 : vector<8xf32> to vector<8x1xf32>
    %cst_25 = arith.constant 3.125000e-02 : f32
    %44 = vector.broadcast %cst_25 : f32 to vector<8x1xf32>
    %45 = arith.mulf %43, %44 : vector<8x1xf32>
    %46 = arith.mulf %41, %41 : vector<8x128xf32>
    %cst_26 = arith.constant dense<0.000000e+00> : vector<8xf32>
    %47 = vector.multi_reduction <add>, %46, %cst_26 [1] : vector<8x128xf32> to vector<8xf32>
    %48 = vector.shape_cast %47 : vector<8xf32> to vector<8x1xf32>
    %cst_27 = arith.constant 3.125000e-02 : f32
    %49 = vector.broadcast %cst_27 : f32 to vector<8x1xf32>
    %50 = arith.mulf %48, %49 : vector<8x1xf32>
    %51 = arith.mulf %45, %45 : vector<8x1xf32>
    %52 = arith.subf %50, %51 : vector<8x1xf32>
    %cst_28 = arith.constant 0.000000e+00 : f32
    %53 = vector.broadcast %cst_28 : f32 to vector<8x1xf32>
    %54 = arith.maximumf %52, %53 : vector<8x1xf32>
    %55 = vector.broadcast %45 : vector<8x1xf32> to vector<8x128xf32>
    %56 = arith.subf %41, %55 : vector<8x128xf32>
    %cst_29 = arith.constant 9.99999974E-6 : f32
    %57 = vector.broadcast %cst_29 : f32 to vector<8x1xf32>
    %58 = arith.addf %54, %57 : vector<8x1xf32>
    %59 = math.rsqrt %58 : vector<8x1xf32>
    %60 = vector.broadcast %59 : vector<8x1xf32> to vector<8x128xf32>
    %61 = arith.mulf %56, %60 : vector<8x128xf32>
    %62 = vector.broadcast %36 : vector<1x128xf32> to vector<8x128xf32>
    %63 = arith.mulf %61, %62 : vector<8x128xf32>
    %64 = vector.broadcast %37 : vector<1x128xf32> to vector<8x128xf32>
    %65 = arith.addf %63, %64 : vector<8x128xf32>
    %66 = math.tanh %65 : vector<8x128xf32>
    %67 = arith.mulf %66, %66 : vector<8x128xf32>
    %cst_30 = arith.constant dense<0.000000e+00> : vector<8xf32>
    %68 = vector.multi_reduction <add>, %67, %cst_30 [1] : vector<8x128xf32> to vector<8xf32>
    %69 = vector.shape_cast %68 : vector<8xf32> to vector<8x1xf32>
    %cst_31 = arith.constant 1.000000e-24 : f32
    %70 = vector.broadcast %cst_31 : f32 to vector<8x1xf32>
    %71 = arith.maximumf %69, %70 : vector<8x1xf32>
    %72 = math.rsqrt %71 : vector<8x1xf32>
    %73 = vector.broadcast %72 : vector<8x1xf32> to vector<8x128xf32>
    %74 = arith.mulf %66, %73 : vector<8x128xf32>
    %c0_32 = arith.constant 0 : index
    %c0_33 = arith.constant 0 : index
    %75 = vector.load %arg10[%c0_32, %c0_33] : memref<8x128xf32, #tpu.memory_space<vmem>>, vector<8x128xf32>
    tpu.vector_store %arg10[%c0_32, %c0_33], %74 {strides = array<i32>} : memref<8x128xf32, #tpu.memory_space<vmem>>, vector<8x128xf32>,
    return
  }
  func.func @transform_0(%arg0: i32) -> (i32, i32) {
    %c0_i32 = arith.constant 0 : i32
    %c0_i32_0 = arith.constant 0 : i32
    return %arg0, %c0_i32 : i32, i32
  }
  func.func @transform_1(%arg0: i32) -> (i32, i32) {
    %c0_i32 = arith.constant 0 : i32
    %c0_i32_0 = arith.constant 0 : i32
    %c0_i32_1 = arith.constant 0 : i32
    return %c0_i32, %c0_i32_0 : i32, i32
  }
  func.func @transform_2(%arg0: i32) -> (i32, i32) {
    %c0_i32 = arith.constant 0 : i32
    %c0_i32_0 = arith.constant 0 : i32
    %c0_i32_1 = arith.constant 0 : i32
    return %c0_i32, %c0_i32_0 : i32, i32
  }
  func.func @transform_3(%arg0: i32) -> (i32, i32) {
    %c0_i32 = arith.constant 0 : i32
    %c0_i32_0 = arith.constant 0 : i32
    %c0_i32_1 = arith.constant 0 : i32
    return %c0_i32, %c0_i32_0 : i32, i32
  }
  func.func @transform_4(%arg0: i32) -> (i32, i32) {
    %c0_i32 = arith.constant 0 : i32
    %c0_i32_0 = arith.constant 0 : i32
    %c0_i32_1 = arith.constant 0 : i32
    return %c0_i32, %c0_i32_0 : i32, i32
  }
  func.func @transform_5(%arg0: i32) -> (i32, i32) {
    %c0_i32 = arith.constant 0 : i32
    %c0_i32_0 = arith.constant 0 : i32
    %c0_i32_1 = arith.constant 0 : i32
    return %c0_i32, %c0_i32_0 : i32, i32
  }
  func.func @transform_6(%arg0: i32) -> (i32, i32) {
    %c0_i32 = arith.constant 0 : i32
    %c0_i32_0 = arith.constant 0 : i32
    %c0_i32_1 = arith.constant 0 : i32
    return %c0_i32, %c0_i32_0 : i32, i32
  }
  func.func @transform_7(%arg0: i32) -> (i32, i32) {
    %c0_i32 = arith.constant 0 : i32
    %c0_i32_0 = arith.constant 0 : i32
    %c0_i32_1 = arith.constant 0 : i32
    return %c0_i32, %c0_i32_0 : i32, i32
  }
  func.func @transform_8(%arg0: i32) -> (i32, i32) {
    %c0_i32 = arith.constant 0 : i32
    %c0_i32_0 = arith.constant 0 : i32
    %c0_i32_1 = arith.constant 0 : i32
    return %c0_i32, %c0_i32_0 : i32, i32
  }
  func.func @transform_9(%arg0: i32) -> (i32, i32) {
    %c0_i32 = arith.constant 0 : i32
    %c0_i32_0 = arith.constant 0 : i32
    return %arg0, %c0_i32 : i32, i32
  }
}

</mosaic_0001>

<bundles_post_ra>
// kernel: tpu_custom_call.1
= control target key start
LH: loop header
LB: loop body
LE: loop exit
PB: predicated region body
PF: predicated region fallthrough
CT: control target
= control target key end

     0   :  { %14 = vsyncpa [#allocation3], 0  ;;  %s721_s0 = inlined_call_operand.hbm [shape: f32[8,128], index: 0, kind: input, shape index: {}]   ;;  %s722_s1 = inlined_call_operand.hbm [shape: bf16[128,128], index: 1, kind: input, shape index: {}]   ;;  %s723_s2 = inlined_call_operand.vmem [shape: f32[1,128], index: 2, kind: input, shape index: {}]   ;;  %s724_s3 = inlined_call_operand.vmem [shape: f32[1,128], index: 3, kind: input, shape index: {}]   ;;  %s725_s4 = inlined_call_operand.vmem [shape: f32[1,128], index: 4, kind: input, shape index: {}]   ;;  %s726_s5 = inlined_call_operand.hbm [shape: bf16[128,128], index: 5, kind: input, shape index: {}]   ;;  %s727_s6 = inlined_call_operand.vmem [shape: f32[1,128], index: 6, kind: input, shape index: {}]   ;;  %s728_s7 = inlined_call_operand.vmem [shape: f32[1,128], index: 7, kind: input, shape index: {}]   ;;  %s729_s8 = inlined_call_operand.vmem [shape: f32[1,128], index: 8, kind: input, shape index: {}]   ;;  %s730_s9 = inlined_call_operand.hbm [shape: f32[8,128], index: 9, kind: output, shape index: {}]  }
   0x1   :  { %15 = vsyncpa [#allocation6], 0 }
   0x2   :  { %16 = vsyncpa [#allocation4], 0  ;;  %s591_s30 = smov [#allocation5]   ;;  %s497_s13 = scalar_lea.hbm %s722_s1, 1024 }
   0x3   :  { %s32_s10 = sshll.u32 %s591_s30, 4  ;;  %p498_p0 = scmp.ne.s32.totalorder %s722_s1, %s497_s13  ;;  %s33_s10 = int_to_ptr.vmem [resolvable:$true] %s32_s10 }
   0x4   :  { %p501_p1 = scmp.lt.u32.totalorder %s497_s13, %s722_s1 }
   0x6   :  { %p503_p2 = pnand %p501_p1, %p498_p0 }
   0x8   :  { %506 = shalt.err (!%p503_p2)
}
   0x9   :  { %s507_s18 = scalar_lea.vmem %s33_s10, 1024  ;;  %p512_p4 = scmp.lt.s32.totalorder %s33_s10, %s33_s10 }
   0xa   :  { %p508_p3 = scmp.ne.s32.totalorder %s33_s10, %s507_s18  ;;  %p513_p5 = scmp.lt.s32.totalorder %s507_s18, %s507_s18 }
   0xc   :  { %p514_p6 = por %p513_p5, %p512_p4 }
   0xe   :  { %p515_p7 = pnand %p514_p6, %p508_p3 }
  0x10   :  { %518 = shalt.err (!%p515_p7)
}
  0x11   :  { %s592_s19 = smov 64   ;;  %s593_s20 = smov 4  }
  0x12   :  { %38 = dma.hbm_to_vmem [thread:$0]  %s722_s1, 1024, %s33_s10, [#allocation6], %s592_s19, %s592_s19, %s593_s20  }
  0x13   :  { %s594_s23 = smov [#allocation2]   ;;  %s595_s25 = smov [#allocation7]  }
  0x14   :  { %s23_s24 = sshll.u32 %s594_s23, 4  ;;  %s50_s26 = sshll.u32 %s595_s25, 4  ;;  %s24_s24 = int_to_ptr.vmem [resolvable:$true] %s23_s24  ;;  %s51_s26 = int_to_ptr.vmem [resolvable:$true] %s50_s26 }
  0x15   :  { %s519_s29 = scalar_lea.hbm %s721_s0, 128 }
  0x16   :  { %p520_p8 = scmp.ne.s32.totalorder %s721_s0, %s519_s29  ;;  %p523_p9 = scmp.lt.u32.totalorder %s519_s29, %s721_s0 }
  0x18   :  { %p525_p10 = pnand %p523_p9, %p520_p8 }
  0x1a   :  { %528 = shalt.err (!%p525_p10)
}
  0x1b   :  { %s529_s1 = scalar_lea.vmem %s24_s24, 128  ;;  %p534_p12 = scmp.lt.s32.totalorder %s24_s24, %s24_s24 }
  0x1c   :  { %p530_p11 = scmp.ne.s32.totalorder %s24_s24, %s529_s1  ;;  %p535_p13 = scmp.lt.s32.totalorder %s529_s1, %s529_s1 }
  0x1e   :  { %p536_p0 = por %p535_p13, %p534_p12 }
  0x20   :  { %p537_p1 = pnand %p536_p0, %p530_p11 }
  0x22   :  { %540 = shalt.err (!%p537_p1)
}
  0x23   :  { %26 = dma.hbm_to_vmem [thread:$0]  %s721_s0, 128, %s24_s24, [#allocation3]  }
  0x24   :  { %s541_s17 = scalar_lea.hbm %s726_s5, 1024 }
  0x25   :  { %p542_p2 = scmp.ne.s32.totalorder %s726_s5, %s541_s17  ;;  %p545_p3 = scmp.lt.u32.totalorder %s541_s17, %s726_s5 }
  0x27   :  { %p547_p4 = pnand %p545_p3, %p542_p2 }
  0x29   :  { %550 = shalt.err (!%p547_p4)
}
  0x2a   :  { %s551_s25 = scalar_lea.vmem %s51_s26, 1024  ;;  %p556_p6 = scmp.lt.s32.totalorder %s51_s26, %s51_s26 }
  0x2b   :  { %p552_p5 = scmp.ne.s32.totalorder %s51_s26, %s551_s25  ;;  %p557_p7 = scmp.lt.s32.totalorder %s551_s25, %s551_s25 }
  0x2d   :  { %p558_p8 = por %p557_p7, %p556_p6 }
  0x2f   :  { %p559_p9 = pnand %p558_p8, %p552_p5 }
  0x31   :  { %562 = shalt.err (!%p559_p9)
}
  0x32   :  { %56 = dma.hbm_to_vmem [thread:$0]  %s726_s5, 1024, %s51_s26, [#allocation6], %s592_s19, %s592_s19, %s593_s20  }
  0x33   :  { %585 = dma.done.wait [#allocation3], 128  }
  0x34   :  { %586 = vsyncadd [#allocation3], 4294967168 }
  0x35   :  { %587 = dma.done.wait [#allocation6], 2048  }
  0x36   :  { %588 = vsyncadd [#allocation6], 4294965248  ;;  %v596_v0 = vmov 0.0   ;;  %vm597_vm0 = vmmov 0   ;;  %v471_v1 = vld [vmem:[#allocation5] sm:$0xff]   ;;  %v472_v2 = vld [vmem:[#allocation5 + $0x8] sm:$0xff]  }
  0x37   :  { %423 = vmatprep.subr.bf16.mxu0 %v596_v0  ;;  %439 = vmatprep.mubr.msk.bf16.mxu0 %vm597_vm0, %v596_v0  ;;  %v473_v3 = vld [vmem:[#allocation5 + $0x10] sm:$0xff]   ;;  %v474_v4 = vld [vmem:[#allocation5 + $0x18] sm:$0xff]   ;;  %v475_v5 = vld [vmem:[#allocation5 + $0x20] sm:$0xff]   ;;  %s598_s11 = smov [#allocation8]  }
  0x38   :  { %443 = vmatprep.subr.bf16.mxu1 %v596_v0  ;;  %459 = vmatprep.mubr.msk.bf16.mxu1 %vm597_vm0, %v596_v0  ;;  %v476_v6 = vld [vmem:[#allocation5 + $0x28] sm:$0xff]   ;;  %v477_v7 = vld [vmem:[#allocation5 + $0x30] sm:$0xff]   ;;  %v478_v8 = vld [vmem:[#allocation5 + $0x38] sm:$0xff]   ;;  %s373_s12 = sshll.u32 %s598_s11, 4  ;;  %s374_s12 = int_to_ptr.vmem [resolvable:$true] %s373_s12 }
  0x39   :  { %424 = vmatpush3.bf16.msra.mxu0 %v471_v1  ;;  %v73_v9 = vld [vmem:[#allocation2] sm:$0xff]  ;;  %v479_v18 = vld [vmem:[#allocation7] sm:$0xff]   ;;  %v480_v19 = vld [vmem:[#allocation7 + $0x8] sm:$0xff]   ;;  %p568_p11 = scmp.lt.s32.totalorder %s374_s12, %s374_s12 }
  0x3a   :  { %425 = vmatprep.subr.bf16.mxu0 %v596_v0  ;;  %v93_v10 = vpack.c.bf16 %v73_v9, %v73_v9  ;;  %v383_v11 = vld [vmem:[%s723_s2] ss:$0 sm:$0xff]  ;;  %444 = vmatpush3.bf16.msra.mxu1 %v479_v18  ;;  %v481_v20 = vld [vmem:[#allocation7 + $0x10] sm:$0xff]   ;;  %v483_v22 = vld [vmem:[#allocation7 + $0x20] sm:$0xff]  }
  0x3b   :  { %445 = vmatprep.subr.bf16.mxu1 %v596_v0  ;;  %v482_v21 = vld [vmem:[#allocation7 + $0x18] sm:$0xff]   ;;  %v484_v23 = vld [vmem:[#allocation7 + $0x28] sm:$0xff]   ;;  %v485_v24 = vld [vmem:[#allocation7 + $0x30] sm:$0xff]  }
  0x3c   :  { %v486_v25 = vld [vmem:[#allocation7 + $0x38] sm:$0xff]  }
  0x3d   :  { %426 = vmatpush3.bf16.msra.mxu0 %v472_v2  ;;  %v392_v36 = vld [vmem:[%s724_s3] ss:$0 sm:$0xff] }
  0x3e   :  { %427 = vmatprep.subr.bf16.mxu0 %v596_v0  ;;  %446 = vmatpush3.bf16.msra.mxu1 %v480_v19  ;;  %v393_v38 = vld [vmem:[%s725_s4] ss:$0 sm:$0xff] }
  0x3f   :  { %447 = vmatprep.subr.bf16.mxu1 %v596_v0  ;;  %v394_v43 = vld [vmem:[%s727_s6] ss:$0 sm:$0xff] }
  0x40   :  { %v403_v60 = vld [vmem:[%s728_s7] ss:$0 sm:$0xff]  ;;  %s563_s7 = scalar_lea.vmem %s374_s12, 128 }
  0x41   :  { %428 = vmatpush3.bf16.msra.mxu0 %v473_v3  ;;  %v404_v62 = vld [vmem:[%s729_s8] ss:$0 sm:$0xff]  ;;  %p564_p10 = scmp.ne.s32.totalorder %s374_s12, %s563_s7  ;;  %p569_p12 = scmp.lt.s32.totalorder %s563_s7, %s563_s7 }
  0x42   :  { %429 = vmatprep.subr.bf16.mxu0 %v596_v0  ;;  %448 = vmatpush3.bf16.msra.mxu1 %v481_v20 }
  0x43   :  { %449 = vmatprep.subr.bf16.mxu1 %v596_v0  ;;  %p570_p13 = por %p569_p12, %p568_p11 }
  0x45   :  { %430 = vmatpush3.bf16.msra.mxu0 %v474_v4  ;;  %p571_p0 = pnand %p570_p13, %p564_p10 }
  0x46   :  { %431 = vmatprep.subr.bf16.mxu0 %v596_v0  ;;  %450 = vmatpush3.bf16.msra.mxu1 %v482_v21 }
  0x47   :  { %451 = vmatprep.subr.bf16.mxu1 %v596_v0 }
  0x49   :  { %432 = vmatpush3.bf16.msra.mxu0 %v475_v5 }
  0x4a   :  { %433 = vmatprep.subr.bf16.mxu0 %v596_v0  ;;  %452 = vmatpush3.bf16.msra.mxu1 %v483_v22 }
  0x4b   :  { %453 = vmatprep.subr.bf16.mxu1 %v596_v0 }
  0x4d   :  { %434 = vmatpush3.bf16.msra.mxu0 %v476_v6 }
  0x4e   :  { %435 = vmatprep.subr.bf16.mxu0 %v596_v0  ;;  %454 = vmatpush3.bf16.msra.mxu1 %v484_v23 }
  0x4f   :  { %455 = vmatprep.subr.bf16.mxu1 %v596_v0 }
  0x51   :  { %436 = vmatpush3.bf16.msra.mxu0 %v477_v7 }
  0x52   :  { %437 = vmatprep.subr.bf16.mxu0 %v596_v0  ;;  %456 = vmatpush3.bf16.msra.mxu1 %v485_v24 }
  0x53   :  { %457 = vmatprep.subr.bf16.mxu1 %v596_v0 }
  0x55   :  { %438 = vmatpush3.bf16.msra.mxu0 %v478_v8 }
  0x56   :  { %458 = vmatpush3.bf16.msra.mxu1 %v486_v25 }
  0x58   :  { %440 = vmatmul.mubr.bf16.vlgmr.msra.gmra.mrb[0].mxu0 %v93_v10 }
 0x12b   :  { %v182_v12 = vpop.f32.mrb[0].mxu0 }
 0x12c   :  { %v183_v13 = vadd.f32 %v383_v11, %v182_v12  ;;  %v441_v14 = vpop.f32.mrb[1].mxu0 }
 0x12d   :  { %v185_v15 = vpop.f32.mrb[2].mxu0 }
 0x12e   :  { %188 = vadd.xlane.f32.xlu0 %v183_v13  ;;  %v442_v16 = vpop.f32.mrb[3].mxu0  ;;  %v191_v17 = vmul.f32 %v183_v13, %v183_v13 }
 0x132   :  { %192 = vadd.xlane.f32.xlu0 %v191_v17 }
 0x1bb   :  { %v189_v26 = vpop.xlane.xlu0 %188 }
 0x1bc   :  { %v190_v27 = vmul.f32 0.03125, %v189_v26 }
 0x1be   :  { %v195_v29 = vmul.f32 %v190_v27, %v190_v27  ;;  %v198_v34 = vsub.f32 %v183_v13, %v190_v27 }
 0x1bf   :  { %v193_v28 = vpop.xlane.xlu0 %192 }
 0x1c0   :  { %v194_v30 = vmul.f32 0.03125, %v193_v28 }
 0x1c2   :  { %v196_v31 = vsub.f32 %v194_v30, %v195_v29 }
 0x1c4   :  { %v197_v32 = vmax.f32 %v196_v31, 0.0 }
 0x1c6   :  { %v199_v33 = vadd.f32 1e-05, %v197_v32 }
 0x1c8   :  { %487 = vrsqrt.f32 %v199_v33 }
 0x1d2   :  { %v488_v35 = vpop.eup %487 }
 0x1d3   :  { %v201_v37 = vmul.f32 %v488_v35, %v198_v34 }
 0x1d5   :  { %v208_v39 = vmul.f32 %v392_v36, %v201_v37 }
 0x1d7   :  { %v215_v40 = vadd.f32 %v393_v38, %v208_v39 }
 0x1d9   :  { %489 = vtanh.f32 %v215_v40 }
 0x1e3   :  { %v490_v41 = vpop.eup %489 }
 0x1e4   :  { %v236_v42 = vpack.c.bf16 %v490_v41, %v490_v41 }
 0x1e6   :  { %460 = vmatmul.mubr.bf16.vlgmr.msra.gmra.mrb[0].mxu1 %v236_v42 }
 0x2b9   :  { %v325_v44 = vpop.f32.mrb[0].mxu1 }
 0x2ba   :  { %v326_v45 = vadd.f32 %v394_v43, %v325_v44  ;;  %v461_v46 = vpop.f32.mrb[1].mxu1 }
 0x2bb   :  { %v328_v47 = vpop.f32.mrb[2].mxu1 }
 0x2bc   :  { %331 = vadd.xlane.f32.xlu1 %v326_v45  ;;  %v462_v48 = vpop.f32.mrb[3].mxu1  ;;  %v334_v49 = vmul.f32 %v326_v45, %v326_v45 }
 0x2c0   :  { %335 = vadd.xlane.f32.xlu1 %v334_v49 }
 0x349   :  { %v332_v50 = vpop.xlane.xlu1 %331 }
 0x34a   :  { %v333_v51 = vmul.f32 0.03125, %v332_v50 }
 0x34c   :  { %v338_v53 = vmul.f32 %v333_v51, %v333_v51  ;;  %v341_v58 = vsub.f32 %v326_v45, %v333_v51 }
 0x34d   :  { %v336_v52 = vpop.xlane.xlu1 %335 }
 0x34e   :  { %v337_v54 = vmul.f32 0.03125, %v336_v52 }
 0x350   :  { %v339_v55 = vsub.f32 %v337_v54, %v338_v53 }
 0x352   :  { %v340_v56 = vmax.f32 %v339_v55, 0.0 }
 0x354   :  { %v342_v57 = vadd.f32 1e-05, %v340_v56 }
 0x356   :  { %491 = vrsqrt.f32 %v342_v57 }
 0x360   :  { %v492_v59 = vpop.eup %491 }
 0x361   :  { %v344_v61 = vmul.f32 %v492_v59, %v341_v58 }
 0x363   :  { %v351_v63 = vmul.f32 %v403_v60, %v344_v61 }
 0x365   :  { %v358_v0 = vadd.f32 %v404_v62, %v351_v63 }
 0x367   :  { %493 = vtanh.f32 %v358_v0 }
 0x371   :  { %v494_v1 = vpop.eup %493 }
 0x372   :  { %v360_v2 = vmul.f32 %v494_v1, %v494_v1 }
 0x374   :  { %361 = vadd.xlane.f32.xlu0 %v360_v2 }
 0x401   :  { %v362_v3 = vpop.xlane.xlu0 %361 }
 0x402   :  { %v363_v4 = vmax.f32 %v362_v3, 1e-24 }
 0x404   :  { %495 = vrsqrt.f32 %v363_v4 }
 0x40e   :  { %v496_v5 = vpop.eup %495 }
 0x40f   :  { %v365_v6 = vmul.f32 %v496_v5, %v494_v1 }
 0x411   :  { %366 = vst [vmem:[#allocation8] sm:$0xff] %v365_v6 }
 0x412   :  { %574 = shalt.err (!%p571_p0)
}
 0x413   :  { %s575_s1 = scalar_lea.hbm %s730_s9, 128 }
 0x414   :  { %p576_p1 = scmp.ne.s32.totalorder %s730_s9, %s575_s1  ;;  %p579_p2 = scmp.lt.u32.totalorder %s575_s1, %s730_s9 }
 0x416   :  { %p581_p3 = pnand %p579_p2, %p576_p1 }
 0x418   :  { %584 = shalt.err (!%p581_p3)
}
 0x419   :  { %376 = dma.vmem_to_hbm [thread:$0]  %s374_s12, 128, %s730_s9, [#allocation4]  }
 0x41a   :  { %589 = dma.done.wait [#allocation4], 128  }
 0x41b   :  { %590 = vsyncadd [#allocation4], 4294967168 }
 0x41c   :  { %380 = vsyncpa [#allocation3], 1 }
 0x41d   :  { %381 = vsyncpa [#allocation6], 1 }
 0x41e   :  { %382 = vsyncpa [#allocation4], 1 }

</bundles_post_ra>
